<compile_context>
chip_gen: v5e
topology: v5e:2x2
jax: 0.10.0
libtpu: 0.0.40
codegen_flags: <defaults>
</compile_context>

<pallas_src>
import functools

import jax
import jax.numpy as jnp
import numpy as np
from jax.experimental import pallas as pl
from jax.experimental.pallas import tpu as pltpu

FEAT_DIM = 384          # fixed by nn.Linear(384, out_feature_dim)
OUT_DIM = 128           # default out_feature_dim
MAX_TILE_HW = 4096      # spatial columns per grid step (multiple of 128)


def _proj_kernel(x_ref, w_ref, b_ref, o_ref):
    # x_ref: (FEAT_DIM, TILE_HW)   w_ref: (OUT_DIM, FEAT_DIM)
    # b_ref: (OUT_DIM, 1)          o_ref: (OUT_DIM, TILE_HW)
    acc = jnp.dot(w_ref[...], x_ref[...], preferred_element_type=jnp.float32)
    o_ref[...] = (acc + b_ref[...]).astype(o_ref.dtype)


def _pick_tile_hw(hw: int) -> int:
    """Largest legal spatial tile <= MAX_TILE_HW.

    Prefers (a) the full extent when it fits (always a legal block shape),
    then (b) the largest 128-multiple <= MAX_TILE_HW that divides hw evenly
    (unmasked lane-dense stores), falling back to (c) MAX_TILE_HW with a
    ragged, masked last block.
    """
    if hw <= MAX_TILE_HW:
        return hw
    for tile in range(MAX_TILE_HW, 0, -128):
        if hw % tile == 0:
            return tile
    return MAX_TILE_HW


@functools.partial(jax.jit, static_argnames=("tile_hw",))
def _project_nchw(x, w, b2d, *, tile_hw):
    """x: (B, FEAT_DIM, HW). Returns (B, OUT_DIM, HW) = w @ x + b per batch."""
    B, D, HW = x.shape
    OUT = w.shape[0]
    grid = (B, pl.cdiv(HW, tile_hw))
    cost = pl.CostEstimate(
        flops=2 * B * OUT * D * HW,
        transcendentals=0,
        bytes_accessed=(B * D * HW + B * OUT * HW + OUT * D + OUT) * 4,
    )
    return pl.pallas_call(
        _proj_kernel,
        out_shape=jax.ShapeDtypeStruct((B, OUT, HW), x.dtype),
        grid_spec=pltpu.PrefetchScalarGridSpec(
            num_scalar_prefetch=0,
            grid=grid,
            in_specs=[
                # batch dim squeezed out of the kernel view
                pl.BlockSpec((None, D, tile_hw), lambda b, j: (b, 0, j)),
                # grid-invariant weight / bias: fetched once, stay resident
                pl.BlockSpec((OUT, D), lambda b, j: (0, 0)),
                pl.BlockSpec((OUT, 1), lambda b, j: (0, 0)),
            ],
            out_specs=pl.BlockSpec((None, OUT, tile_hw), lambda b, j: (b, 0, j)),
        ),
        compiler_params=pltpu.CompilerParams(
            dimension_semantics=("parallel", "parallel"),
            vmem_limit_bytes=32 << 20,
        ),
        cost_estimate=cost,
    )(x, w, b2d)


def dino_v2_encoder_forward(feats_nchw, weight, bias, chunk_size=32):
    """
    feats_nchw: (B, 384, H, W) encoder feature maps (stand-in for
                self.image_encoder(rgbs[...]) outputs).
    weight:     (out_dim, 384)  -- nn.Linear weight layout.
    bias:       (out_dim,)
    Returns:    (B, out_dim, H, W), identical to the PyTorch module's output.

    Note: the PyTorch chunking loop (chunk_size) is a GPU-memory workaround;
    processing the whole batch in one pallas_call is mathematically identical,
    so `chunk_size` is accepted but unused on TPU.
    """
    del chunk_size
    B, D, H, W = feats_nchw.shape
    assert D == FEAT_DIM
    out_dim = weight.shape[0]
    hw = H * W
    x = feats_nchw.reshape(B, D, hw)                 # free view, no transpose
    b2d = bias.reshape(out_dim, 1)
    tile_hw = _pick_tile_hw(hw)
    out = _project_nchw(x, weight, b2d, tile_hw=tile_hw)  # (B, out_dim, HW)
    return out.reshape(B, out_dim, H, W)


if __name__ == "__main__":
    key = jax.random.PRNGKey(0)
    k_feat, k_w, k_b = jax.random.split(key, 3)

    # Small, deterministic example inputs (encoder output feature maps).
    B, H, W = 2, 16, 16
    feats = jax.random.normal(k_feat, (B, FEAT_DIM, H, W), dtype=jnp.float32)

    # Deterministic init of nn.Linear(384, 128) parameters.
    bound = 1.0 / np.sqrt(FEAT_DIM)
    weight = jax.random.uniform(k_w, (OUT_DIM, FEAT_DIM),
                                minval=-bound, maxval=bound, dtype=jnp.float32)
    bias = jax.random.uniform(k_b, (OUT_DIM,),
                              minval=-bound, maxval=bound, dtype=jnp.float32)

    out = dino_v2_encoder_forward(feats, weight, bias)
    out = jax.block_until_ready(out)
    assert out.shape == (B, OUT_DIM, H, W), out.shape

    # Reference check in plain JAX (same math as the PyTorch forward).
    rows_ref = jnp.transpose(feats, (0, 2, 3, 1)).reshape(-1, FEAT_DIM)
    ref = (rows_ref @ weight.T + bias).reshape(B, H, W, OUT_DIM)
    ref = jnp.transpose(ref, (0, 3, 1, 2))
    np.testing.assert_allclose(np.asarray(out), np.asarray(ref),
                               rtol=1e-5, atol=1e-5)

    print("KERNEL_OK")
</pallas_src>

<mosaic_0001>
module attributes {stable_mosaic.version = 11 : i64} {
  func.func @_proj_kernel(%arg0: i32, %arg1: i32, %arg2: memref<1x384x256xf32, #tpu.memory_space<vmem>>, %arg3: memref<128x384xf32, #tpu.memory_space<vmem>>, %arg4: memref<128x1xf32, #tpu.memory_space<vmem>>, %arg5: memref<1x128x256xf32, #tpu.memory_space<vmem>>) attributes {dimension_semantics = [#tpu.dimension_semantics<parallel>, #tpu.dimension_semantics<parallel>], iteration_bounds = array<i64: 2, 1>, scalar_prefetch = 0 : i64, scratch_operands = 0 : i64, tpu.core_type = #tpu.core_type<tc>, window_params = [{transform_indices = @transform_0, window_bounds = array<i64: 1, 384, 256>}, {pipeline_mode = #tpu.pipeline_mode<synchronous>, transform_indices = @transform_1, window_bounds = array<i64: 128, 384>}, {pipeline_mode = #tpu.pipeline_mode<synchronous>, transform_indices = @transform_2, window_bounds = array<i64: 128, 1>}, {transform_indices = @transform_3, window_bounds = array<i64: 1, 128, 256>}]} {
    %c0 = arith.constant 0 : index
    %c0_0 = arith.constant 0 : index
    %0 = vector.load %arg3[%c0, %c0_0] : memref<128x384xf32, #tpu.memory_space<vmem>>, vector<128x384xf32>
    %c0_1 = arith.constant 0 : index
    %c0_2 = arith.constant 0 : index
    %c0_3 = arith.constant 0 : index
    %1 = vector.load %arg2[%c0_1, %c0_2, %c0_3] : memref<1x384x256xf32, #tpu.memory_space<vmem>>, vector<1x384x256xf32>
    %2 = vector.shape_cast %1 : vector<1x384x256xf32> to vector<384x256xf32>
    %cst = arith.constant dense<0.000000e+00> : vector<128x256xf32>
    %3 = tpu.matmul %0, %2, %cst {dimension_numbers = #tpu.dot_dimension_numbers<[1], [0], [0], [1], [0, 0, 1, 1], [], []>} : vector<128x384xf32>, vector<384x256xf32>, vector<128x256xf32> -> vector<128x256xf32>
    %c0_4 = arith.constant 0 : index
    %c0_5 = arith.constant 0 : index
    %4 = vector.load %arg4[%c0_4, %c0_5] : memref<128x1xf32, #tpu.memory_space<vmem>>, vector<128x1xf32>
    %5 = vector.broadcast %4 : vector<128x1xf32> to vector<128x256xf32>
    %6 = arith.addf %3, %5 : vector<128x256xf32>
    %c0_6 = arith.constant 0 : index
    %c0_7 = arith.constant 0 : index
    %c0_8 = arith.constant 0 : index
    %7 = vector.load %arg5[%c0_6, %c0_7, %c0_8] : memref<1x128x256xf32, #tpu.memory_space<vmem>>, vector<1x128x256xf32>
    %8 = vector.shape_cast %7 : vector<1x128x256xf32> to vector<128x256xf32>
    %9 = vector.shape_cast %6 : vector<128x256xf32> to vector<1x128x256xf32>
    tpu.vector_store %arg5[%c0_6, %c0_7, %c0_8], %9 {strides = array<i32>} : memref<1x128x256xf32, #tpu.memory_space<vmem>>, vector<1x128x256xf32>,
    return
  }
  func.func @transform_0(%arg0: i32, %arg1: i32) -> (i32, i32, i32) {
    %c0_i32 = arith.constant 0 : i32
    %c0_i32_0 = arith.constant 0 : i32
    return %arg0, %c0_i32, %arg1 : i32, i32, i32
  }
  func.func @transform_1(%arg0: i32, %arg1: i32) -> (i32, i32) {
    %c0_i32 = arith.constant 0 : i32
    %c0_i32_0 = arith.constant 0 : i32
    %c0_i32_1 = arith.constant 0 : i32
    return %c0_i32, %c0_i32_0 : i32, i32
  }
  func.func @transform_2(%arg0: i32, %arg1: i32) -> (i32, i32) {
    %c0_i32 = arith.constant 0 : i32
    %c0_i32_0 = arith.constant 0 : i32
    %c0_i32_1 = arith.constant 0 : i32
    return %c0_i32, %c0_i32_0 : i32, i32
  }
  func.func @transform_3(%arg0: i32, %arg1: i32) -> (i32, i32, i32) {
    %c0_i32 = arith.constant 0 : i32
    %c0_i32_0 = arith.constant 0 : i32
    return %arg0, %c0_i32, %arg1 : i32, i32, i32
  }
}

</mosaic_0001>

<bundles_post_ra>
// kernel: _project_nchw.1
= control target key start
LH: loop header
LB: loop body
LE: loop exit
PB: predicated region body
PF: predicated region fallthrough
CT: control target
= control target key end

     0   :  { %8 = vsyncpa [#allocation3], 0  ;;  %s1894_s0 = inlined_call_operand.hbm [shape: f32[2,384,256], index: 0, kind: input, shape index: {}]   ;;  %s1895_s1 = inlined_call_operand.hbm [shape: f32[128,384], index: 1, kind: input, shape index: {}]   ;;  %s1896_s2 = inlined_call_operand.vmem [shape: f32[128,1], index: 2, kind: input, shape index: {}]   ;;  %s1897_s3 = inlined_call_operand.hbm [shape: f32[2,128,256], index: 3, kind: output, shape index: {}]  }
   0x1   :  { %10 = vsyncpa [#allocation3 + $0x1], 0 }
   0x2   :  { %11 = vsyncpa [#allocation6], 0 }
   0x3   :  { %12 = vsyncpa [#allocation4], 0 }
   0x4   :  { %14 = vsyncpa [#allocation4 + $0x1], 0  ;;  %s1314_s12 = smov 0   ;;  %s1316_s13 = smov 0  }
   0x5   :  { %s1318_s14 = smov 0   ;;  %s1320_s15 = smov 0  }
   0x6   :  { %s1322_s16 = smov 0   ;;  %s1324_s17 = smov 0  }
   0x7 LB: > { %s1005_s18 = sadd.s32 4294967295, %s1284_s17   ;;  %s1006_s19 = sadd.s32 4294967294, %s1284_s17   ;;  %s1284_s17 = sphi %s1324_s17, %s20_s17   ;;  %s1280_s16 = sphi %s1322_s16, %s1908_s16   ;;  %s1276_s15 = sphi %s1320_s15, %s1907_s15   ;;  %s1272_s14 = sphi %s1318_s14, %s1906_s14   ;;  %s1268_s13 = sphi %s1316_s13, %s1905_s13   ;;  %s1264_s12 = sphi %s1314_s12, %s1904_s12  }
   0x8   : > { %p54_p0 = scmp.ne.s32.totalorder %s1268_s13, %s1264_s12  ;;  %p1348_p1 = scmp.eq.s32.totalorder %s1005_s18, 0 }
   0x9   : > { %p1352_p2 = scmp.eq.s32.totalorder %s1005_s18, 1  ;;  %p128_p3 = scmp.eq.s32.totalorder %s1006_s19, 1 }
   0xa   : > { %p1358_p4 = por %p1348_p1, %p54_p0  ;;  %p1007_p5 = scmp.ge.s32.totalorder %s1284_s17, 1 }
   0xb   : > { %p1363_p6 = por %p128_p3, %p54_p0  ;;  %p135_p7 = scmp.lt.s32.totalorder %s1284_s17, 3 }
   0xc   : > { %s146_s26 = sshll.u32 %s1895_s1, 4  ;;  %s1286_s28 = smov [#allocation5]   ;;  %s147_s26 = int_to_ptr.hbm [resolvable:$true] %s146_s26 }
   0xd   : > { %p1371_p8 = pnand %p1007_p5, %p135_p7  ;;  %s148_s29 = sshll.u32 %s1286_s28, 4  ;;  %s149_s29 = int_to_ptr.vmem [resolvable:$true] %s148_s29 }
   0xe   : > { %p1009_p11 = scmp.ge.s32.totalorder %s1284_s17, 2  ;;  %s1287_s30 = smov 384  }
   0xf   : > { %p1063_p9 = pneg %p1371_p8  ;;  %s1288_s4 = smov 24  }
  0x10   : > { %s32_s5 = sadd.s32 1, %s1280_s16  ;;  %s41_s6 = sadd.s32 1, %s1272_s14 }
  0x11   : > { %p1064_p10 = pnand %p1063_p9, %p1348_p1  ;;  %p34_p12 = scmp.ge.s32.totalorder %s32_s5, 2 }
  0x12   : > { %p48_p13 = scmp.ne.s32.totalorder %s1272_s14, %s1268_s13  ;;  %p49_p0 = scmp.eq.s32.totalorder %s1284_s17, 0 }
  0x13   : > { %1066 = dma.hbm_to_vmem [thread:$0]  (!%p1064_p10), %s147_s26, 6144, %s149_s29, [#allocation6], %s1287_s30, %s1287_s30, %s1288_s4  }
  0x14   : > { %s1910_s5 = smov (%p34_p12, %s32_s5), 0  ;;  %p50_p3 = por %p49_p0, %p48_p13 }
  0x15   : > { %p1389_p5 = por %p1352_p2, %p48_p13  ;;  %s36_s8 = ssub.s32 %s1280_s16, %s1910_s5 }
  0x16   : > { %p1076_p7 = scmp.lt.s32.totalorder %s1284_s17, 2  ;;  %p39_p9 = scmp.eq.s32.totalorder %s36_s8, 0 }
  0x17   : > { %s165_s9 = sand.u32 1, %s1272_s14   ;;  %s1053_s18 = smul.u32 768, %s1280_s16 }
  0x18   : > { %s1052_s10 = smul.u32 768, %s165_s9  ;;  %p1068_p10 = pnand %p1076_p7, %p50_p3 }
  0x19   : > { %s1398_s11 = scalar_select %p39_p9, %s1272_s14, %s41_s6  }
  0x1a   : > { %s169_s19 = scalar_lea.vmem [#allocation2], %s1052_s10  ;;  %s176_s28 = scalar_lea.hbm %s1894_s0, %s1053_s18 }
  0x1b   : > { %s179_s24 = sshll.u32 %s169_s19, 4  ;;  %s177_s21 = sshll.u32 %s176_s28, 4  ;;  %s180_s24 = int_to_ptr.vmem [resolvable:$true] %s179_s24  ;;  %s178_s21 = int_to_ptr.hbm [resolvable:$true] %s177_s21 }
  0x1c   : > { %s166_s29 = scalar_lea.sflag [#allocation3], %s165_s9  ;;  %s1289_s30 = smov 256  }
  0x1d   : > { %s1290_s4 = smov 16   ;;  %191 = sbr.rel (%p1371_p8) target bundleno = 397 (0x18d), region = 32 }
  0x1e   : > { %1070 = dma.hbm_to_vmem [thread:$0]  (!%p1068_p10), %s178_s21, 12288, %s180_s24, %s166_s29, %s1289_s30, %s1289_s30, %s1290_s4  }
  0x1f   : > { %s1407_s6 = sand.u32 (!%p1371_p8), 1, %s1268_s13  }
  0x20   : > { %s1054_s8 = smul.u32 (!%p1371_p8), 768, %s1407_s6  ;;  %s194_s10 = scalar_lea.sflag (!%p1371_p8), [#allocation3], %s1407_s6 }
  0x22   : > { %s1411_s19 = scalar_lea.vmem [#allocation2], %s1054_s8 }
  0x23   : > { %1251 = dma.done.wait (%p1358_p4), %s194_s10, 12288  }
  0x24   : > { %1253 = vsyncadd (%p1358_p4), %s194_s10, 4294955008 }
  0x25   : > { %1255 = dma.done.wait (%p1348_p1), [#allocation6], 6144  }
  0x26   : > { %1257 = vsyncadd (%p1348_p1), [#allocation6], 4294961152  ;;  %v306_v0 = vld [vmem:[%s1411_s19 + $0xf0] sm:$0xff]  ;;  %v304_v2 = vld [vmem:[%s1411_s19 + $0xe0] sm:$0xff]  ;;  %v1291_v3 = vmov 0   ;;  %s1019_s9 = sshll.u32 %s1276_s15, 8 }
  0x27   : > { %v338_v1 = vld [vmem:[%s1411_s19 + $0x1f0] sm:$0xff]  ;;  %1135 = vset.pattern.permute.xlu0 %v1291_v3  ;;  %1136 = vset.pattern.permute.xlu1 %v1291_v3  ;;  %v336_v4 = vld [vmem:[%s1411_s19 + $0x1e0] sm:$0xff]  ;;  %v1460_v35 = vld [vmem:[#allocation5 + $0xc8] sm:$0xff]  ;;  %s904_s25 = scalar_lea.hbm %s1897_s3, %s1019_s9  ;;  %s891_s15 = scalar_lea.sflag [#allocation4], %s1407_s6 }
  0x28   : > { %1020 = vmatpush.msra.mxu2 %v306_v0  ;;  %1036 = vmatpush.msra.mxu3 %v338_v1  ;;  %v302_v5 = vld [vmem:[%s1411_s19 + $0xd0] sm:$0xff]  ;;  %v300_v7 = vld [vmem:[%s1411_s19 + $0xc0] sm:$0xff]  ;;  %v307_v36 = vld [vmem:[%s1411_s19 + $0xf8] sm:$0xff]  ;;  %s907_s28 = sshll.u32 %s904_s25, 4  ;;  %s1218_s8 = scalar_lea.hbm %s1897_s3, 512  ;;  %s908_s28 = int_to_ptr.hbm [resolvable:$true] %s907_s28 }
  0x29   : > { %v334_v6 = vld [vmem:[%s1411_s19 + $0x1d0] sm:$0xff]  ;;  %468 = vmatpush.msra.mxu0 %v306_v0  ;;  %533 = vmatpush.msra.mxu1 %v338_v1  ;;  %v332_v8 = vld [vmem:[%s1411_s19 + $0x1c0] sm:$0xff]  ;;  %v305_v38 = vld [vmem:[%s1411_s19 + $0xe8] sm:$0xff]  ;;  %s1212_s21 = sshra.s32 %s908_s28, 4  ;;  %s1213_s21 = int_to_ptr.hbm [resolvable:$true] %s1212_s21 }
  0x2a   : > { %1021 = vmatpush.msra.mxu2 %v304_v2  ;;  %1037 = vmatpush.msra.mxu3 %v336_v4  ;;  %v298_v9 = vld [vmem:[%s1411_s19 + $0xb0] sm:$0xff]  ;;  %v296_v11 = vld [vmem:[%s1411_s19 + $0xa0] sm:$0xff]  ;;  %v339_v41 = vld [vmem:[%s1411_s19 + $0x1f8] sm:$0xff]  ;;  %s1214_s29 = scalar_lea.hbm %s1213_s21, 256  ;;  %p1219_p8 = scmp.lt.s32.totalorder %s1213_s21, %s1897_s3 }
  0x2b   : > { %469 = vmatpush.msra.mxu0 %v304_v2  ;;  %534 = vmatpush.msra.mxu1 %v336_v4  ;;  %v330_v10 = vld [vmem:[%s1411_s19 + $0x1b0] sm:$0xff]  ;;  %v328_v12 = vld [vmem:[%s1411_s19 + $0x1a0] sm:$0xff]  ;;  %v303_v42 = vld [vmem:[%s1411_s19 + $0xd8] sm:$0xff]  ;;  %p1215_p1 = scmp.ne.s32.totalorder %s1213_s21, %s1214_s29  ;;  %p1220_p12 = scmp.lt.s32.totalorder %s1218_s8, %s1214_s29 }
  0x2c   : > { %1022 = vmatpush.msra.mxu2 %v302_v5  ;;  %1038 = vmatpush.msra.mxu3 %v334_v6  ;;  %v294_v13 = vld [vmem:[%s1411_s19 + $0x90] sm:$0xff]  ;;  %v292_v15 = vld [vmem:[%s1411_s19 + $0x80] sm:$0xff]  ;;  %v373_v44 = vld [vmem:[%s1896_s2 + $0x8] sm:$0xff] }
  0x2d   : > { %470 = vmatpush.msra.mxu0 %v302_v5  ;;  %535 = vmatpush.msra.mxu1 %v334_v6  ;;  %v326_v14 = vld [vmem:[%s1411_s19 + $0x190] sm:$0xff]  ;;  %v324_v16 = vld [vmem:[%s1411_s19 + $0x180] sm:$0xff]  ;;  %v1479_v45 = vld [vmem:[#allocation5 + $0x8] sm:$0xff]  ;;  %p1216_p2 = pnand %p1215_p1, %p1389_p5  ;;  %p1221_p13 = por %p1220_p12, %p1219_p8 }
  0x2e   : > { %1023 = vmatpush.msra.mxu2 %v300_v7  ;;  %1039 = vmatpush.msra.mxu3 %v332_v8  ;;  %v290_v17 = vld [vmem:[%s1411_s19 + $0x70] sm:$0xff]  ;;  %v288_v19 = vld [vmem:[%s1411_s19 + $0x60] sm:$0xff]  ;;  %v1482_v47 = vld [vmem:[#allocation5 + $0xd8] sm:$0xff] }
  0x2f   : > { %471 = vmatpush.msra.mxu0 %v300_v7  ;;  %536 = vmatpush.msra.mxu1 %v332_v8  ;;  %v322_v18 = vld [vmem:[%s1411_s19 + $0x170] sm:$0xff]  ;;  %v320_v20 = vld [vmem:[%s1411_s19 + $0x160] sm:$0xff]  ;;  %v371_v49 = vld [vmem:[%s1411_s19 + $0x2f8] sm:$0xff]  ;;  %p1217_p4 = pneg %p1216_p2 }
  0x30   : > { %1024 = vmatpush.msra.mxu2 %v298_v9  ;;  %1040 = vmatpush.msra.mxu3 %v330_v10  ;;  %v286_v21 = vld [vmem:[%s1411_s19 + $0x50] sm:$0xff]  ;;  %v284_v23 = vld [vmem:[%s1411_s19 + $0x40] sm:$0xff]  ;;  %v301_v50 = vld [vmem:[%s1411_s19 + $0xc8] sm:$0xff] }
  0x31   : > { %472 = vmatpush.msra.mxu0 %v298_v9  ;;  %537 = vmatpush.msra.mxu1 %v330_v10  ;;  %v318_v22 = vld [vmem:[%s1411_s19 + $0x150] sm:$0xff]  ;;  %v316_v24 = vld [vmem:[%s1411_s19 + $0x140] sm:$0xff]  ;;  %v337_v51 = vld [vmem:[%s1411_s19 + $0x1e8] sm:$0xff]  ;;  %p1222_p0 = pnand %p1221_p13, %p1217_p4 }
  0x32   : > { %1025 = vmatpush.msra.mxu2 %v296_v11  ;;  %1041 = vmatpush.msra.mxu3 %v328_v12  ;;  %v372_v25 = vld [vmem:[%s1896_s2] sm:$0xff]  ;;  %v282_v26 = vld [vmem:[%s1411_s19 + $0x30] sm:$0xff]  ;;  %v369_v53 = vld [vmem:[%s1411_s19 + $0x2e8] sm:$0xff] }
  0x33   : > { %473 = vmatpush.msra.mxu0 %v296_v11  ;;  %538 = vmatpush.msra.mxu1 %v328_v12  ;;  %v314_v27 = vld [vmem:[%s1411_s19 + $0x130] sm:$0xff]  ;;  %v280_v28 = vld [vmem:[%s1411_s19 + $0x20] sm:$0xff]  ;;  %v1494_v54 = vld [vmem:[#allocation5 + $0x18] sm:$0xff] }
  0x34   : > { %1026 = vmatpush.msra.mxu2 %v294_v13  ;;  %1042 = vmatpush.msra.mxu3 %v326_v14  ;;  %v312_v29 = vld [vmem:[%s1411_s19 + $0x120] sm:$0xff]  ;;  %v278_v30 = vld [vmem:[%s1411_s19 + $0x10] sm:$0xff]  ;;  %v299_v55 = vld [vmem:[%s1411_s19 + $0xb8] sm:$0xff] }
  0x35   : > { %474 = vmatpush.msra.mxu0 %v294_v13  ;;  %539 = vmatpush.msra.mxu1 %v326_v14  ;;  %v310_v31 = vld [vmem:[%s1411_s19 + $0x110] sm:$0xff]  ;;  %v276_v32 = vld [vmem:[%s1411_s19] sm:$0xff]  ;;  %v335_v56 = vld [vmem:[%s1411_s19 + $0x1d8] sm:$0xff] }
  0x36   : > { %1027 = vmatpush.msra.mxu2 %v292_v15  ;;  %1043 = vmatpush.msra.mxu3 %v324_v16  ;;  %v308_v33 = vld [vmem:[%s1411_s19 + $0x100] sm:$0xff]  ;;  %v370_v37 = vld [vmem:[%s1411_s19 + $0x2f0] sm:$0xff]  ;;  %v375_v57 = vld [vmem:[%s1896_s2 + $0x18] sm:$0xff] }
  0x37   : > { %475 = vmatpush.msra.mxu0 %v292_v15  ;;  %540 = vmatpush.msra.mxu1 %v324_v16  ;;  %v1458_v34 = vld [vmem:[#allocation5 + $0xc0] sm:$0xff]  ;;  %v374_v43 = vld [vmem:[%s1896_s2 + $0x10] sm:$0xff]  ;;  %v367_v58 = vld [vmem:[%s1411_s19 + $0x2d8] sm:$0xff] }
  0x38   : > { %1028 = vmatpush.msra.mxu2 %v290_v17  ;;  %1044 = vmatpush.msra.mxu3 %v322_v18  ;;  %v1467_v39 = vld [vmem:[#allocation5] sm:$0xff]  ;;  %v366_v46 = vld [vmem:[%s1411_s19 + $0x2d0] sm:$0xff]  ;;  %v297_v62 = vld [vmem:[%s1411_s19 + $0xa8] sm:$0xff] }
  0x39   : > { %476 = vmatpush.msra.mxu0 %v290_v17  ;;  %541 = vmatpush.msra.mxu1 %v322_v18  ;;  %v368_v40 = vld [vmem:[%s1411_s19 + $0x2e0] sm:$0xff]  ;;  %v378_v59 = vld [vmem:[%s1896_s2 + $0x30] sm:$0xff]  ;;  %v1512_v0 = vld [vmem:[#allocation5 + $0xf8] sm:$0xff] }
  0x3a   : > { %1029 = vmatpush.msra.mxu2 %v288_v19  ;;  %1045 = vmatpush.msra.mxu3 %v320_v20  ;;  %v1484_v48 = vld [vmem:[#allocation5 + $0xe0] sm:$0xff]  ;;  %v362_v60 = vld [vmem:[%s1411_s19 + $0x2b0] sm:$0xff]  ;;  %v333_v1 = vld [vmem:[%s1411_s19 + $0x1c8] sm:$0xff] }
  0x3b   : > { %477 = vmatpush.msra.mxu0 %v288_v19  ;;  %542 = vmatpush.msra.mxu1 %v320_v20  ;;  %v364_v52 = vld [vmem:[%s1411_s19 + $0x2c0] sm:$0xff]  ;;  %v1510_v63 = vld [vmem:[#allocation5 + $0xf0] sm:$0xff]  ;;  %v365_v2 = vld [vmem:[%s1411_s19 + $0x2c8] sm:$0xff] }
  0x3c   : > { %1030 = vmatpush.msra.mxu2 %v286_v21  ;;  %1046 = vmatpush.msra.mxu3 %v318_v22  ;;  %v1507_v61 = vld [vmem:[#allocation5 + $0x20] sm:$0xff]  ;;  %v1520_v5 = vld [vmem:[#allocation5 + $0x30] sm:$0xff]  ;;  %v295_v6 = vld [vmem:[%s1411_s19 + $0x98] sm:$0xff] }
  0x3d   : > { %478 = vmatpush.msra.mxu0 %v286_v21  ;;  %543 = vmatpush.msra.mxu1 %v318_v22  ;;  %v360_v4 = vld [vmem:[%s1411_s19 + $0x2a0] sm:$0xff]  ;;  %v331_v7 = vld [vmem:[%s1411_s19 + $0x1b8] sm:$0xff]  ;;  %v381_v11 = vld [vmem:[%s1896_s2 + $0x48] sm:$0xff] }
  0x3e   : > { %1031 = vmatpush.msra.mxu2 %v284_v23  ;;  %1047 = vmatpush.msra.mxu3 %v316_v24  ;;  %v376_v8 = vld [vmem:[%s1896_s2 + $0x20] sm:$0xff]  ;;  %v379_v9 = vld [vmem:[%s1896_s2 + $0x38] sm:$0xff]  ;;  %v358_v12 = vld [vmem:[%s1411_s19 + $0x290] sm:$0xff] }
  0x3f   : > { %479 = vmatpush.msra.mxu0 %v284_v23  ;;  %390 = vperm.xlu0 %1135, %v372_v25   ;;  %v363_v10 = vld [vmem:[%s1411_s19 + $0x2b8] sm:$0xff]  ;;  %v293_v13 = vld [vmem:[%s1411_s19 + $0x88] sm:$0xff]  ;;  %v1542_v15 = vld [vmem:[#allocation5 + $0x110] sm:$0xff] }
  0x40   : > { %1032 = vmatpush.msra.mxu2 %v282_v26  ;;  %1048 = vmatpush.msra.mxu3 %v314_v27  ;;  %v1540_v14 = vld [vmem:[#allocation5 + $0x108] sm:$0xff]  ;;  %v356_v18 = vld [vmem:[%s1411_s19 + $0x280] sm:$0xff]  ;;  %v291_v19 = vld [vmem:[%s1411_s19 + $0x78] sm:$0xff] }
  0x41   : > { %480 = vmatpush.msra.mxu0 %v282_v26  ;;  %544 = vmatpush.msra.mxu1 %v316_v24  ;;  %v329_v16 = vld [vmem:[%s1411_s19 + $0x1a8] sm:$0xff]  ;;  %v359_v21 = vld [vmem:[%s1411_s19 + $0x298] sm:$0xff]  ;;  %v382_v24 = vld [vmem:[%s1896_s2 + $0x50] sm:$0xff] }
  0x42   : > { %1033 = vmatpush.msra.mxu2 %v280_v28  ;;  %1049 = vmatpush.msra.mxu3 %v312_v29  ;;  %v361_v17 = vld [vmem:[%s1411_s19 + $0x2a8] sm:$0xff]  ;;  %v327_v22 = vld [vmem:[%s1411_s19 + $0x198] sm:$0xff]  ;;  %v354_v25 = vld [vmem:[%s1411_s19 + $0x270] sm:$0xff] }
  0x43   : > { %481 = vmatpush.msra.mxu0 %v280_v28  ;;  %545 = vmatpush.msra.mxu1 %v314_v27  ;;  %v1551_v20 = vld [vmem:[#allocation5 + $0x48] sm:$0xff]  ;;  %v1565_v28 = vld [vmem:[#allocation5 + $0x50] sm:$0xff] }
  0x44   : > { %1034 = vmatpush.msra.mxu2 %v278_v30  ;;  %1050 = vmatpush.msra.mxu3 %v310_v31  ;;  %v377_v23 = vld [vmem:[%s1896_s2 + $0x28] sm:$0xff] }
  0x45   : > { %482 = vmatpush.msra.mxu0 %v278_v30  ;;  %546 = vmatpush.msra.mxu1 %v312_v29  ;;  %v289_v26 = vld [vmem:[%s1411_s19 + $0x68] sm:$0xff]  ;;  %v352_v29 = vld [vmem:[%s1411_s19 + $0x260] sm:$0xff] }
  0x46   : > { %1035 = vmatpush.msra.mxu2 %v276_v32  ;;  %1051 = vmatpush.msra.mxu3 %v308_v33  ;;  %v325_v27 = vld [vmem:[%s1411_s19 + $0x188] sm:$0xff]  ;;  %v1568_v30 = vld [vmem:[#allocation5 + $0x120] sm:$0xff] }
  0x47   : > { %508 = vmatmul.f32.vlgmr.msra.gmra.mxu2 %v1458_v34  ;;  %573 = vmatmul.f32.vlgmr.msra.gmra.mxu3 %v1460_v35 }
  0x48   : > { %663 = vmatpush.msrb.mxu3 %v307_v36  ;;  %598 = vmatpush.msrb.mxu2 %v370_v37  ;;  %v323_v36 = vld [vmem:[%s1411_s19 + $0x178] sm:$0xff]  ;;  %v350_v37 = vld [vmem:[%s1411_s19 + $0x250] sm:$0xff] }
  0x49   : > { %483 = vmatpush.msra.mxu0 %v276_v32  ;;  %547 = vmatpush.msra.mxu1 %v310_v31  ;;  %v1570_v31 = vld [vmem:[#allocation5 + $0x128] sm:$0xff] }
  0x4a   : > { %664 = vmatpush.msrb.mxu3 %v305_v38  ;;  %484 = vmatmul.f32.vlgmr.msra.gmra.mxu0 %v1467_v39  ;;  %v357_v32 = vld [vmem:[%s1411_s19 + $0x288] sm:$0xff]  ;;  %v1579_v38 = vld [vmem:[#allocation5 + $0x60] sm:$0xff] }
  0x4b   : > { %599 = vmatpush.msrb.mxu2 %v368_v40  ;;  %728 = vmatpush.msrb.mxu0 %v339_v41  ;;  %v355_v40 = vld [vmem:[%s1411_s19 + $0x278] sm:$0xff]  ;;  %v380_v41 = vld [vmem:[%s1896_s2 + $0x40] sm:$0xff] }
  0x4c   : > { %665 = vmatpush.msrb.mxu3 %v303_v42  ;;  %400 = vperm.xlu1 %1136, %v374_v43   ;;  %v285_v42 = vld [vmem:[%s1411_s19 + $0x48] sm:$0xff] }
  0x4d   : > { %395 = vperm.xlu0 %1135, %v373_v44   ;;  %548 = vmatpush.msra.mxu1 %v308_v33  ;;  %v287_v33 = vld [vmem:[%s1411_s19 + $0x58] sm:$0xff]  ;;  %v321_v43 = vld [vmem:[%s1411_s19 + $0x168] sm:$0xff] }
  0x4e   : > { %549 = vmatmul.f32.vlgmr.msra.gmra.mxu1 %v1479_v45  ;;  %600 = vmatpush.msrb.mxu2 %v366_v46  ;;  %v353_v44 = vld [vmem:[%s1411_s19 + $0x268] sm:$0xff]  ;;  %v348_v46 = vld [vmem:[%s1411_s19 + $0x240] sm:$0xff] }
  0x4f   : > { %511 = vmatmul.f32.gmra.mxu2 %v1482_v47  ;;  %576 = vmatmul.f32.gmra.mxu3 %v1484_v48 }
  0x50   : > { %793 = vmatpush.msrb.mxu1 %v371_v49  ;;  %666 = vmatpush.msrb.mxu3 %v301_v50  ;;  %v283_v49 = vld [vmem:[%s1411_s19 + $0x38] sm:$0xff]  ;;  %v1591_v50 = vld [vmem:[#allocation5 + $0x68] sm:$0xff] }
  0x51   : > { %729 = vmatpush.msrb.mxu0 %v337_v51  ;;  %601 = vmatpush.msrb.mxu2 %v364_v52  ;;  %v319_v51 = vld [vmem:[%s1411_s19 + $0x158] sm:$0xff] }
  0x52   : > { %794 = vmatpush.msrb.mxu1 %v369_v53  ;;  %487 = vmatmul.f32.gmra.mxu0 %v1494_v54  ;;  %v1594_v52 = vld [vmem:[#allocation5 + $0x138] sm:$0xff]  ;;  %v1596_v53 = vld [vmem:[#allocation5 + $0x140] sm:$0xff] }
  0x53   : > { %667 = vmatpush.msrb.mxu3 %v299_v55  ;;  %730 = vmatpush.msrb.mxu0 %v335_v56  ;;  %v384_v55 = vld [vmem:[%s1896_s2 + $0x60] sm:$0xff]  ;;  %v351_v56 = vld [vmem:[%s1411_s19 + $0x258] sm:$0xff] }
  0x54   : > { %405 = vperm.xlu1 %1136, %v375_v57   ;;  %795 = vmatpush.msrb.mxu1 %v367_v58  ;;  %v346_v57 = vld [vmem:[%s1411_s19 + $0x230] sm:$0xff]  ;;  %v281_v58 = vld [vmem:[%s1411_s19 + $0x28] sm:$0xff] }
  0x55   : > { %420 = vperm.xlu0 %1135, %v378_v59   ;;  %602 = vmatpush.msrb.mxu2 %v362_v60  ;;  %v1607_v59 = vld [vmem:[#allocation5 + $0x78] sm:$0xff]  ;;  %v349_v60 = vld [vmem:[%s1411_s19 + $0x248] sm:$0xff] }
  0x56   : > { %552 = vmatmul.f32.gmra.mxu1 %v1507_v61  ;;  %668 = vmatpush.msrb.mxu3 %v297_v62  ;;  %v317_v62 = vld [vmem:[%s1411_s19 + $0x148] sm:$0xff] }
  0x57   : > { %514 = vmatmul.f32.gmra.mxu2 %v1510_v63  ;;  %579 = vmatmul.f32.gmra.mxu3 %v1512_v0 }
  0x58   : > { %731 = vmatpush.msrb.mxu0 %v333_v1  ;;  %796 = vmatpush.msrb.mxu1 %v365_v2  ;;  %v344_v1 = vld [vmem:[%s1411_s19 + $0x220] sm:$0xff]  ;;  %v279_v2 = vld [vmem:[%s1411_s19 + $0x18] sm:$0xff] }
  0x59   : > { %1137 = vset.pattern.permute.xlu2 %v1291_v3  ;;  %603 = vmatpush.msrb.mxu2 %v360_v4  ;;  %v1537_v3 = vld [vmem:[#allocation5 + $0x38] sm:$0xff]  ;;  %v385_v4 = vld [vmem:[%s1896_s2 + $0x68] sm:$0xff] }
  0x5a   : > { %490 = vmatmul.f32.gmra.mxu0 %v1520_v5  ;;  %669 = vmatpush.msrb.mxu3 %v295_v6  ;;  %v315_v6 = vld [vmem:[%s1411_s19 + $0x138] sm:$0xff] }
  0x5b   : > { %732 = vmatpush.msrb.mxu0 %v331_v7  ;;  %410 = vperm.xlu2 %1137, %v376_v8   ;;  %v347_v7 = vld [vmem:[%s1411_s19 + $0x238] sm:$0xff]  ;;  %v1619_v8 = vld [vmem:[#allocation5 + $0x80] sm:$0xff] }
  0x5c   : > { %425 = vperm.xlu1 %1136, %v379_v9   ;;  %797 = vmatpush.msrb.mxu1 %v363_v10  ;;  %v342_v9 = vld [vmem:[%s1411_s19 + $0x210] sm:$0xff] }
  0x5d   : > { %435 = vperm.xlu0 %1135, %v381_v11   ;;  %604 = vmatpush.msrb.mxu2 %v358_v12  ;;  %v1622_v10 = vld [vmem:[#allocation5 + $0x150] sm:$0xff]  ;;  %v1624_v11 = vld [vmem:[#allocation5 + $0x158] sm:$0xff]  ;;  %v277_v12 = vld [vmem:[%s1411_s19 + $0x8] sm:$0xff] }
  0x5e   : > { %555 = vmatmul.f32.gmra.mxu1 %v1537_v3  ;;  %670 = vmatpush.msrb.mxu3 %v293_v13  ;;  %v313_v13 = vld [vmem:[%s1411_s19 + $0x128] sm:$0xff] }
  0x5f   : > { %517 = vmatmul.f32.gmra.mxu2 %v1540_v14  ;;  %582 = vmatmul.f32.gmra.mxu3 %v1542_v15 }
  0x60   : > { %733 = vmatpush.msrb.mxu0 %v329_v16  ;;  %798 = vmatpush.msrb.mxu1 %v361_v17  ;;  %v345_v16 = vld [vmem:[%s1411_s19 + $0x228] sm:$0xff]  ;;  %v340_v17 = vld [vmem:[%s1411_s19 + $0x200] sm:$0xff] }
  0x61   : > { %605 = vmatpush.msrb.mxu2 %v356_v18  ;;  %671 = vmatpush.msrb.mxu3 %v291_v19  ;;  %v1633_v18 = vld [vmem:[#allocation5 + $0x90] sm:$0xff]  ;;  %v383_v19 = vld [vmem:[%s1896_s2 + $0x58] sm:$0xff] }
  0x62   : > { %493 = vmatmul.f32.gmra.mxu0 %v1551_v20  ;;  %799 = vmatpush.msrb.mxu1 %v359_v21  ;;  %v311_v21 = vld [vmem:[%s1411_s19 + $0x118] sm:$0xff] }
  0x63   : > { %734 = vmatpush.msrb.mxu0 %v327_v22  ;;  %415 = vperm.xlu2 %1137, %v377_v23   ;;  %v343_v22 = vld [vmem:[%s1411_s19 + $0x218] sm:$0xff] }
  0x64   : > { %440 = vperm.xlu1 %1136, %v382_v24   ;;  %606 = vmatpush.msrb.mxu2 %v354_v25  ;;  %v387_v23 = vld [vmem:[%s1896_s2 + $0x78] sm:$0xff]  ;;  %v309_v24 = vld [vmem:[%s1411_s19 + $0x108] sm:$0xff] }
  0x65   : > { %672 = vmatpush.msrb.mxu3 %v289_v26  ;;  %735 = vmatpush.msrb.mxu0 %v325_v27  ;;  %v341_v25 = vld [vmem:[%s1411_s19 + $0x208] sm:$0xff]  ;;  %v247_v26 = vld [vmem:[#allocation5 + $0x98] sm:$0xff]  ;;  %s1013_s19 = sshll.u32 %s1407_s6, 8 }
  0x66   : > { %558 = vmatmul.f32.gmra.mxu1 %v1565_v28  ;;  %607 = vmatpush.msrb.mxu2 %v352_v29  ;;  %v1646_v27 = vld [vmem:[#allocation5 + $0x168] sm:$0xff]  ;;  %v1648_v29 = vld [vmem:[#allocation5 + $0x170] sm:$0xff]  ;;  %s1779_s27 = scalar_lea.vmem [#allocation7], %s1013_s19 }
  0x67   : > { %520 = vmatmul.f32.gmra.mxu2 %v1568_v30  ;;  %585 = vmatmul.f32.gmra.mxu3 %v1570_v31  ;;  %s905_s26 = sshll.u32 %s1779_s27, 4  ;;  %s906_s26 = int_to_ptr.vmem [resolvable:$true] %s905_s26 }
  0x68   : > { %800 = vmatpush.msrb.mxu1 %v357_v32  ;;  %673 = vmatpush.msrb.mxu3 %v287_v33  ;;  %v249_v32 = vld [vmem:[#allocation5 + $0xa8] sm:$0xff]  ;;  %v386_v33 = vld [vmem:[%s1896_s2 + $0x70] sm:$0xff] }
  0x69   : > { %736 = vmatpush.msrb.mxu0 %v323_v36  ;;  %608 = vmatpush.msrb.mxu2 %v350_v37  ;;  %v250_v36 = vld [vmem:[#allocation5 + $0xb0] sm:$0xff] }
  0x6a   : > { %496 = vmatmul.f32.gmra.mxu0 %v1579_v38  ;;  %801 = vmatpush.msrb.mxu1 %v355_v40  ;;  %v230_v37 = vld [vmem:[#allocation5 + $0x10] sm:$0xff]  ;;  %v233_v40 = vld [vmem:[#allocation5 + $0x28] sm:$0xff] }
  0x6b   : > { %430 = vperm.xlu2 %1137, %v380_v41   ;;  %674 = vmatpush.msrb.mxu3 %v285_v42  ;;  %v236_v41 = vld [vmem:[#allocation5 + $0x40] sm:$0xff]  ;;  %v239_v42 = vld [vmem:[#allocation5 + $0x58] sm:$0xff] }
  0x6c   : > { %737 = vmatpush.msrb.mxu0 %v321_v43  ;;  %802 = vmatpush.msrb.mxu1 %v353_v44  ;;  %v254_v43 = vld [vmem:[#allocation5 + $0xd0] sm:$0xff] }
  0x6d   : > { %609 = vmatpush.msrb.mxu2 %v348_v46  ;;  %675 = vmatpush.msrb.mxu3 %v283_v49 }
  0x6e   : > { %561 = vmatmul.f32.gmra.mxu1 %v1591_v50  ;;  %738 = vmatpush.msrb.mxu0 %v319_v51 }
  0x6f   : > { %523 = vmatmul.f32.gmra.mxu2 %v1594_v52  ;;  %588 = vmatmul.f32.gmra.mxu3 %v1596_v53 }
  0x70   : > { %450 = vperm.xlu0 %1135, %v384_v55   ;;  %803 = vmatpush.msrb.mxu1 %v351_v56 }
  0x71   : > { %610 = vmatpush.msrb.mxu2 %v346_v57  ;;  %676 = vmatpush.msrb.mxu3 %v281_v58  ;;  %v257_v58 = vld [vmem:[#allocation5 + $0xe8] sm:$0xff] }
  0x72   : > { %499 = vmatmul.f32.gmra.mxu0 %v1607_v59  ;;  %804 = vmatpush.msrb.mxu1 %v349_v60 }
  0x73   : > { %739 = vmatpush.msrb.mxu0 %v317_v62  ;;  %611 = vmatpush.msrb.mxu2 %v344_v1 }
  0x74   : > { %677 = vmatpush.msrb.mxu3 %v279_v2  ;;  %455 = vperm.xlu1 %1136, %v385_v4  }
  0x75   : > { %740 = vmatpush.msrb.mxu0 %v315_v6  ;;  %805 = vmatpush.msrb.mxu1 %v347_v7  ;;  %v260_v6 = vld [vmem:[#allocation5 + $0x100] sm:$0xff] }
  0x76   : > { %564 = vmatmul.f32.gmra.mxu1 %v1619_v8  ;;  %612 = vmatpush.msrb.mxu2 %v342_v9 }
  0x77   : > { %526 = vmatmul.f32.gmra.mxu2 %v1622_v10  ;;  %591 = vmatmul.f32.gmra.mxu3 %v1624_v11 }
  0x78   : > { %678 = vmatpush.msrb.mxu3 %v277_v12  ;;  %741 = vmatpush.msrb.mxu0 %v313_v13 }
  0x79   : > { %806 = vmatpush.msrb.mxu1 %v345_v16  ;;  %613 = vmatpush.msrb.mxu2 %v340_v17  ;;  %v263_v16 = vld [vmem:[#allocation5 + $0x118] sm:$0xff] }
  0x7a   : > { %502 = vmatmul.f32.gmra.mxu0 %v1633_v18  ;;  %445 = vperm.xlu2 %1137, %v383_v19  }
  0x7b   : > { %742 = vmatpush.msrb.mxu0 %v311_v21  ;;  %807 = vmatpush.msrb.mxu1 %v343_v22 }
  0x7c   : > { %465 = vperm.xlu0 %1135, %v387_v23   ;;  %v266_v23 = vld [vmem:[#allocation5 + $0x130] sm:$0xff] }
  0x7d   : > { %743 = vmatpush.msrb.mxu0 %v309_v24  ;;  %808 = vmatpush.msrb.mxu1 %v341_v25 }
  0x7e   : > { %567 = vmatmul.f32.gmra.mxu1 %v247_v26 }
  0x7f   : > { %529 = vmatmul.f32.gmra.mxu2 %v1646_v27  ;;  %594 = vmatmul.f32.gmra.mxu3 %v1648_v29 }
  0x82   : > { %505 = vmatmul.f32.gmra.mxu0 %v249_v32  ;;  %460 = vperm.xlu2 %1137, %v386_v33  }
  0x86   : > { %570 = vmatmul.f32.gmra.mxu1 %v250_v36 }
  0x87   : > { %614 = vmatmul.f32.vlgmr.msrb.gmra.mxu2 %v230_v37  ;;  %679 = vmatmul.f32.vlgmr.msrb.gmra.mxu3 %v1467_v39  ;;  %v242_v39 = vld [vmem:[#allocation5 + $0x70] sm:$0xff] }
  0x8a   : > { %744 = vmatmul.f32.vlgmr.msrb.gmra.mxu0 %v1479_v45  ;;  %v245_v45 = vld [vmem:[#allocation5 + $0x88] sm:$0xff] }
  0x8e   : > { %809 = vmatmul.f32.vlgmr.msrb.gmra.mxu1 %v230_v37 }
  0x8f   : > { %617 = vmatmul.f32.gmra.mxu2 %v233_v40  ;;  %682 = vmatmul.f32.gmra.mxu3 %v1494_v54  ;;  %v248_v54 = vld [vmem:[#allocation5 + $0xa0] sm:$0xff] }
  0x92   : > { %747 = vmatmul.f32.gmra.mxu0 %v1507_v61 }
  0x96   : > { %812 = vmatmul.f32.gmra.mxu1 %v233_v40 }
  0x97   : > { %620 = vmatmul.f32.gmra.mxu2 %v236_v41  ;;  %685 = vmatmul.f32.gmra.mxu3 %v1520_v5 }
  0x9a   : > { %750 = vmatmul.f32.gmra.mxu0 %v1537_v3  ;;  %v251_v3 = vld [vmem:[#allocation5 + $0xb8] sm:$0xff] }
  0x9e   : > { %815 = vmatmul.f32.gmra.mxu1 %v236_v41 }
  0x9f   : > { %623 = vmatmul.f32.gmra.mxu2 %v239_v42  ;;  %688 = vmatmul.f32.gmra.mxu3 %v1551_v20 }
  0xa2   : > { %753 = vmatmul.f32.gmra.mxu0 %v1565_v28 }
  0xa6   : > { %818 = vmatmul.f32.gmra.mxu1 %v239_v42 }
  0xa7   : > { %626 = vmatmul.f32.gmra.mxu2 %v242_v39  ;;  %691 = vmatmul.f32.gmra.mxu3 %v1579_v38 }
  0xaa   : > { %756 = vmatmul.f32.gmra.mxu0 %v1591_v50 }
  0xae   : > { %821 = vmatmul.f32.gmra.mxu1 %v242_v39 }
  0xaf   : > { %629 = vmatmul.f32.gmra.mxu2 %v245_v45  ;;  %694 = vmatmul.f32.gmra.mxu3 %v1607_v59 }
  0xb1   : > { %v1669_v5 = vpop.permute.xlu0 %390 }
  0xb2   : > { %759 = vmatmul.f32.gmra.mxu0 %v1619_v8 }
  0xb5   : > { %v1667_v61 = vpop.permute.xlu2 %410 }
  0xb6   : > { %824 = vmatmul.f32.gmra.mxu1 %v245_v45  ;;  %v272_v45 = vld [vmem:[#allocation5 + $0x160] sm:$0xff] }
  0xb7   : > { %632 = vmatmul.f32.gmra.mxu2 %v248_v54  ;;  %697 = vmatmul.f32.gmra.mxu3 %v1633_v18 }
  0xba   : > { %762 = vmatmul.f32.gmra.mxu0 %v247_v26 }
  0xbd   : > { %v1672_v20 = vpop.permute.xlu2 %415 }
  0xbe   : > { %827 = vmatmul.f32.gmra.mxu1 %v248_v54  ;;  %v1674_v28 = vpop.permute.xlu1 %400 }
  0xbf   : > { %635 = vmatmul.f32.gmra.mxu2 %v251_v3  ;;  %700 = vmatmul.f32.gmra.mxu3 %v249_v32  ;;  %v1676_v38 = vpop.permute.xlu0 %395 }
  0xc2   : > { %765 = vmatmul.f32.gmra.mxu0 %v250_v36  ;;  %v269_v36 = vld [vmem:[#allocation5 + $0x148] sm:$0xff] }
  0xc5   : > { %v1685_v50 = vpop.permute.xlu2 %430 }
  0xc6   : > { %830 = vmatmul.f32.gmra.mxu1 %v251_v3  ;;  %v1678_v44 = vpop.permute.xlu1 %405 }
  0xc7   : > { %638 = vmatmul.f32.gmra.mxu2 %v254_v43  ;;  %703 = vmatmul.f32.gmra.mxu3 %v1458_v34  ;;  %v1681_v46 = vpop.permute.xlu0 %420  ;;  %v1683_v49 = vpop.f32.mrf.mxu0 }
  0xca   : > { %v509_v51 = vpop.f32.mrf.mxu2  ;;  %v574_v55 = vpop.f32.mrf.mxu3  ;;  %768 = vmatmul.f32.gmra.mxu0 %v1460_v35 }
  0xcb   : > { %v510_v56 = vadd.f32 %v509_v51, %v1685_v50  ;;  %v1689_v57 = vpop.f32.mrf.mxu1 }
  0xcd   : > { %v1691_v59 = vadd.f32 %v574_v55, %v510_v56  ;;  %v275_v56 = vld [vmem:[#allocation5 + $0x178] sm:$0xff] }
  0xce   : > { %833 = vmatmul.f32.gmra.mxu1 %v254_v43  ;;  %v1693_v60 = vpop.permute.xlu1 %425 }
  0xcf   : > { %641 = vmatmul.f32.gmra.mxu2 %v257_v58  ;;  %706 = vmatmul.f32.gmra.mxu3 %v1482_v47  ;;  %v1696_v34 = vpop.f32.mrf.mxu0  ;;  %v1698_v62 = vpop.permute.xlu0 %435 }
  0xd2   : > { %v512_v1 = vpop.f32.mrf.mxu2  ;;  %v577_v2 = vpop.f32.mrf.mxu3  ;;  %771 = vmatmul.f32.gmra.mxu0 %v1484_v48 }
  0xd3   : > { %v513_v35 = vadd.f32 %v512_v1, %v1698_v62  ;;  %v1702_v4 = vpop.f32.mrf.mxu1 }
  0xd4   : > { %v1720_v18 = vpop.permute.xlu2 %445 }
  0xd5   : > { %v1704_v7 = vadd.f32 %v577_v2, %v513_v35 }
  0xd6   : > { %836 = vmatmul.f32.gmra.mxu1 %v257_v58  ;;  %v1709_v8 = vpop.permute.xlu1 %440 }
  0xd7   : > { %644 = vmatmul.f32.gmra.mxu2 %v260_v6  ;;  %709 = vmatmul.f32.gmra.mxu3 %v1510_v63  ;;  %v1707_v47 = vpop.f32.mrf.mxu0 }
  0xda   : > { %v515_v9 = vpop.f32.mrf.mxu2  ;;  %v580_v12 = vpop.f32.mrf.mxu3  ;;  %774 = vmatmul.f32.gmra.mxu0 %v1512_v0 }
  0xdb   : > { %v516_v48 = vadd.f32 %v515_v9, %v1709_v8  ;;  %v1713_v13 = vpop.f32.mrf.mxu1  ;;  %v486_v9 = vadd.f32 %v1683_v49, %v1669_v5 }
  0xdc   : > { %v1753_v3 = vpop.permute.xlu2 %460 }
  0xdd   : > { %v1715_v17 = vadd.f32 %v580_v12, %v516_v48  ;;  %v551_v48 = vadd.f32 %v1689_v57, %v486_v9 }
  0xde   : > { %839 = vmatmul.f32.gmra.mxu1 %v260_v6 }
  0xdf   : > { %647 = vmatmul.f32.gmra.mxu2 %v263_v16  ;;  %712 = vmatmul.f32.gmra.mxu3 %v1540_v14  ;;  %v1718_v63 = vpop.f32.mrf.mxu0 }
  0xe2   : > { %v518_v19 = vpop.f32.mrf.mxu2  ;;  %v583_v21 = vpop.f32.mrf.mxu3  ;;  %777 = vmatmul.f32.gmra.mxu0 %v1542_v15 }
  0xe3   : > { %v519_v0 = vadd.f32 %v518_v19, %v1720_v18  ;;  %v1724_v22 = vpop.f32.mrf.mxu1  ;;  %v1731_v25 = vpop.permute.xlu0 %450 }
  0xe5   : > { %v1726_v24 = vadd.f32 %v583_v21, %v519_v0 }
  0xe6   : > { %842 = vmatmul.f32.gmra.mxu1 %v263_v16  ;;  %v1742_v40 = vpop.permute.xlu1 %455 }
  0xe7   : > { %650 = vmatmul.f32.gmra.mxu2 %v266_v23  ;;  %715 = vmatmul.f32.gmra.mxu3 %v1568_v30  ;;  %v1729_v14 = vpop.f32.mrf.mxu0 }
  0xea   : > { %v521_v26 = vpop.f32.mrf.mxu2  ;;  %v586_v32 = vpop.f32.mrf.mxu3  ;;  %780 = vmatmul.f32.gmra.mxu0 %v1570_v31 }
  0xeb   : > { %v522_v15 = vadd.f32 %v521_v26, %v1731_v25  ;;  %v1735_v33 = vpop.f32.mrf.mxu1 }
  0xed   : > { %v1737_v37 = vadd.f32 %v586_v32, %v522_v15 }
  0xee   : > { %845 = vmatmul.f32.gmra.mxu1 %v266_v23  ;;  %v1764_v1 = vpop.permute.xlu0 %465  ;;  %v489_v23 = vadd.f32 %v1696_v34, %v1676_v38 }
  0xef   : > { %653 = vmatmul.f32.gmra.mxu2 %v269_v36  ;;  %718 = vmatmul.f32.gmra.mxu3 %v1594_v52  ;;  %v1740_v30 = vpop.f32.mrf.mxu0 }
  0xf0   : > { %v554_v57 = vadd.f32 %v1702_v4, %v489_v23 }
  0xf2   : > { %v524_v41 = vpop.f32.mrf.mxu2  ;;  %v589_v42 = vpop.f32.mrf.mxu3  ;;  %783 = vmatmul.f32.gmra.mxu0 %v1596_v53 }
  0xf3   : > { %v525_v31 = vadd.f32 %v524_v41, %v1742_v40  ;;  %v1746_v39 = vpop.f32.mrf.mxu1 }
  0xf5   : > { %v1748_v54 = vadd.f32 %v589_v42, %v525_v31  ;;  %v492_v42 = vadd.f32 %v1707_v47, %v1674_v28 }
  0xf6   : > { %848 = vmatmul.f32.gmra.mxu1 %v269_v36 }
  0xf7   : > { %656 = vmatmul.f32.gmra.mxu2 %v272_v45  ;;  %721 = vmatmul.f32.gmra.mxu3 %v1622_v10  ;;  %v1751_v52 = vpop.f32.mrf.mxu0 }
  0xfa   : > { %v527_v43 = vpop.f32.mrf.mxu2  ;;  %v592_v51 = vpop.f32.mrf.mxu3  ;;  %786 = vmatmul.f32.gmra.mxu0 %v1624_v11 }
  0xfb   : > { %v528_v53 = vadd.f32 %v527_v43, %v1753_v3  ;;  %v1757_v55 = vpop.f32.mrf.mxu1 }
  0xfd   : > { %v1759_v58 = vadd.f32 %v592_v51, %v528_v53  ;;  %v557_v51 = vadd.f32 %v1713_v13, %v492_v42 }
  0xfe   : > { %851 = vmatmul.f32.gmra.mxu1 %v272_v45 }
  0xff   : > { %659 = vmatmul.f32.gmra.mxu2 %v275_v56  ;;  %724 = vmatmul.f32.gmra.mxu3 %v1646_v27  ;;  %v1762_v10 = vpop.f32.mrf.mxu0 }
 0x102   : > { %v530_v2 = vpop.f32.mrf.mxu2  ;;  %v595_v35 = vpop.f32.mrf.mxu3  ;;  %789 = vmatmul.f32.gmra.mxu0 %v1648_v29 }
 0x103   : > { %v531_v11 = vadd.f32 %v530_v2, %v1764_v1  ;;  %v1768_v6 = vpop.f32.mrf.mxu1 }
 0x105   : > { %v1772_v12 = vadd.f32 %v595_v35, %v531_v11 }
 0x106   : > { %854 = vmatmul.f32.gmra.mxu1 %v275_v56 }
 0x107   : > { %v745_v27 = vpop.f32.mrf.mxu0 }
 0x10a   : > { %v615_v16 = vpop.f32.mrf.mxu2  ;;  %v680_v19 = vpop.f32.mrf.mxu3 }
 0x10b   : > { %v616_v21 = vadd.f32 %v615_v16, %v551_v48  ;;  %v681_v0 = vadd.f32 %v680_v19, %v1669_v5  ;;  %v810_v29 = vpop.f32.mrf.mxu1 }
 0x10d   : > { %858 = vst [vmem:[%s1779_s27] sm:$0xff] %v616_v21  ;;  %v746_v49 = vadd.f32 %v745_v27, %v681_v0 }
 0x10f   : > { %v811_v26 = vadd.f32 %v810_v29, %v746_v49  ;;  %v748_v32 = vpop.f32.mrf.mxu0 }
 0x111   : > { %859 = vst [vmem:[%s1779_s27 + $0x8] sm:$0xff] %v811_v26 }
 0x112   : > { %v618_v15 = vpop.f32.mrf.mxu2  ;;  %v683_v36 = vpop.f32.mrf.mxu3 }
 0x113   : > { %v619_v5 = vadd.f32 %v618_v15, %v554_v57  ;;  %v684_v41 = vadd.f32 %v683_v36, %v1676_v38  ;;  %v813_v34 = vpop.f32.mrf.mxu1  ;;  %v495_v38 = vadd.f32 %v1718_v63, %v1678_v44 }
 0x115   : > { %860 = vst [vmem:[%s1779_s27 + $0x10] sm:$0xff] %v619_v5  ;;  %v749_v31 = vadd.f32 %v748_v32, %v684_v41  ;;  %v560_v27 = vadd.f32 %v1724_v22, %v495_v38 }
 0x117   : > { %v814_v45 = vadd.f32 %v813_v34, %v749_v31  ;;  %v751_v43 = vpop.f32.mrf.mxu0 }
 0x119   : > { %861 = vst [vmem:[%s1779_s27 + $0x18] sm:$0xff] %v814_v45 }
 0x11a   : > { %v621_v4 = vpop.f32.mrf.mxu2  ;;  %v686_v53 = vpop.f32.mrf.mxu3 }
 0x11b   : > { %v622_v56 = vadd.f32 %v621_v4, %v557_v51  ;;  %v687_v2 = vadd.f32 %v686_v53, %v1674_v28  ;;  %v816_v35 = vpop.f32.mrf.mxu1  ;;  %v498_v28 = vadd.f32 %v1729_v14, %v1667_v61 }
 0x11d   : > { %862 = vst [vmem:[%s1779_s27 + $0x20] sm:$0xff] %v622_v56  ;;  %v752_v47 = vadd.f32 %v751_v43, %v687_v2  ;;  %v563_v23 = vadd.f32 %v1735_v33, %v498_v28 }
 0x11f   : > { %v817_v11 = vadd.f32 %v816_v35, %v752_v47  ;;  %v754_v9 = vpop.f32.mrf.mxu0 }
 0x121   : > { %863 = vst [vmem:[%s1779_s27 + $0x28] sm:$0xff] %v817_v11 }
 0x122   : > { %v624_v13 = vpop.f32.mrf.mxu2  ;;  %v689_v48 = vpop.f32.mrf.mxu3 }
 0x123   : > { %v625_v16 = vadd.f32 %v624_v13, %v560_v27  ;;  %v690_v19 = vadd.f32 %v689_v48, %v1678_v44  ;;  %v819_v21 = vpop.f32.mrf.mxu1  ;;  %v501_v44 = vadd.f32 %v1740_v30, %v1672_v20 }
 0x125   : > { %864 = vst [vmem:[%s1779_s27 + $0x30] sm:$0xff] %v625_v16  ;;  %v755_v63 = vadd.f32 %v754_v9, %v690_v19  ;;  %v566_v5 = vadd.f32 %v1746_v39, %v501_v44 }
 0x127   : > { %v820_v0 = vadd.f32 %v819_v21, %v755_v63  ;;  %v757_v29 = vpop.f32.mrf.mxu0 }
 0x129   : > { %865 = vst [vmem:[%s1779_s27 + $0x38] sm:$0xff] %v820_v0 }
 0x12a   : > { %v627_v22 = vpop.f32.mrf.mxu2  ;;  %v692_v49 = vpop.f32.mrf.mxu3 }
 0x12b   : > { %v628_v26 = vadd.f32 %v627_v22, %v563_v23  ;;  %v693_v32 = vadd.f32 %v692_v49, %v1667_v61  ;;  %v822_v57 = vpop.f32.mrf.mxu1  ;;  %v504_v61 = vadd.f32 %v1751_v52, %v1681_v46 }
 0x12d   : > { %866 = vst [vmem:[%s1779_s27 + $0x40] sm:$0xff] %v628_v26  ;;  %v758_v14 = vadd.f32 %v757_v29, %v693_v32  ;;  %v569_v51 = vadd.f32 %v1757_v55, %v504_v61 }
 0x12f   : > { %v823_v15 = vadd.f32 %v822_v57, %v758_v14  ;;  %v760_v36 = vpop.f32.mrf.mxu0 }
 0x131   : > { %867 = vst [vmem:[%s1779_s27 + $0x48] sm:$0xff] %v823_v15 }
 0x132   : > { %v630_v33 = vpop.f32.mrf.mxu2  ;;  %v695_v41 = vpop.f32.mrf.mxu3 }
 0x133   : > { %v631_v34 = vadd.f32 %v630_v33, %v566_v5  ;;  %v696_v42 = vadd.f32 %v695_v41, %v1672_v20  ;;  %v825_v31 = vpop.f32.mrf.mxu1  ;;  %v507_v20 = vadd.f32 %v1762_v10, %v1693_v60 }
 0x135   : > { %868 = vst [vmem:[%s1779_s27 + $0x50] sm:$0xff] %v631_v34  ;;  %v761_v30 = vadd.f32 %v760_v36, %v696_v42  ;;  %v572_v47 = vadd.f32 %v1768_v6, %v507_v20 }
 0x137   : > { %v826_v45 = vadd.f32 %v825_v31, %v761_v30  ;;  %v763_v43 = vpop.f32.mrf.mxu0 }
 0x139   : > { %869 = vst [vmem:[%s1779_s27 + $0x58] sm:$0xff] %v826_v45 }
 0x13a   : > { %v633_v39 = vpop.f32.mrf.mxu2  ;;  %v698_v4 = vpop.f32.mrf.mxu3 }
 0x13b   : > { %v634_v53 = vadd.f32 %v633_v39, %v569_v51  ;;  %v699_v56 = vadd.f32 %v698_v4, %v1681_v46  ;;  %v828_v2 = vpop.f32.mrf.mxu1 }
 0x13d   : > { %870 = vst [vmem:[%s1779_s27 + $0x60] sm:$0xff] %v634_v53  ;;  %v764_v52 = vadd.f32 %v763_v43, %v699_v56 }
 0x13f   : > { %v829_v35 = vadd.f32 %v828_v2, %v764_v52  ;;  %v766_v38 = vpop.f32.mrf.mxu0 }
 0x141   : > { %871 = vst [vmem:[%s1779_s27 + $0x68] sm:$0xff] %v829_v35 }
 0x142   : > { %v636_v55 = vpop.f32.mrf.mxu2  ;;  %v701_v11 = vpop.f32.mrf.mxu3 }
 0x143   : > { %v637_v9 = vadd.f32 %v636_v55, %v572_v47  ;;  %v702_v27 = vadd.f32 %v701_v11, %v1693_v60  ;;  %v831_v46 = vpop.f32.mrf.mxu1 }
 0x145   : > { %872 = vst [vmem:[%s1779_s27 + $0x70] sm:$0xff] %v637_v9  ;;  %v767_v13 = vadd.f32 %v766_v38, %v702_v27 }
 0x147   : > { %v832_v48 = vadd.f32 %v831_v46, %v767_v13  ;;  %v769_v10 = vpop.f32.mrf.mxu0 }
 0x149   : > { %873 = vst [vmem:[%s1779_s27 + $0x78] sm:$0xff] %v832_v48 }
 0x14a   : > { %v639_v16 = vpop.f32.mrf.mxu2  ;;  %v704_v19 = vpop.f32.mrf.mxu3 }
 0x14b   : > { %v640_v21 = vadd.f32 %v639_v16, %v1691_v59  ;;  %v705_v6 = vadd.f32 %v704_v19, %v1685_v50  ;;  %v834_v28 = vpop.f32.mrf.mxu1 }
 0x14d   : > { %874 = vst [vmem:[%s1779_s27 + $0x80] sm:$0xff] %v640_v21  ;;  %v770_v63 = vadd.f32 %v769_v10, %v705_v6 }
 0x14f   : > { %v835_v0 = vadd.f32 %v834_v28, %v770_v63  ;;  %v772_v60 = vpop.f32.mrf.mxu0 }
 0x151   : > { %875 = vst [vmem:[%s1779_s27 + $0x88] sm:$0xff] %v835_v0 }
 0x152   : > { %v642_v29 = vpop.f32.mrf.mxu2  ;;  %v707_v23 = vpop.f32.mrf.mxu3 }
 0x153   : > { %v643_v22 = vadd.f32 %v642_v29, %v1704_v7  ;;  %v708_v49 = vadd.f32 %v707_v23, %v1698_v62  ;;  %v837_v26 = vpop.f32.mrf.mxu1 }
 0x155   : > { %876 = vst [vmem:[%s1779_s27 + $0x90] sm:$0xff] %v643_v22  ;;  %v773_v59 = vadd.f32 %v772_v60, %v708_v49 }
 0x157   : > { %v838_v32 = vadd.f32 %v837_v26, %v773_v59  ;;  %v775_v50 = vpop.f32.mrf.mxu0 }
 0x159   : > { %877 = vst [vmem:[%s1779_s27 + $0x98] sm:$0xff] %v838_v32 }
 0x15a   : > { %v645_v57 = vpop.f32.mrf.mxu2  ;;  %v710_v44 = vpop.f32.mrf.mxu3 }
 0x15b   : > { %v646_v14 = vadd.f32 %v645_v57, %v1715_v17  ;;  %v711_v15 = vadd.f32 %v710_v44, %v1709_v8  ;;  %v840_v36 = vpop.f32.mrf.mxu1 }
 0x15d   : > { %878 = vst [vmem:[%s1779_s27 + $0xa0] sm:$0xff] %v646_v14  ;;  %v776_v7 = vadd.f32 %v775_v50, %v711_v15 }
 0x15f   : > { %v841_v5 = vadd.f32 %v840_v36, %v776_v7  ;;  %v778_v62 = vpop.f32.mrf.mxu0 }
 0x161   : > { %879 = vst [vmem:[%s1779_s27 + $0xa8] sm:$0xff] %v841_v5 }
 0x162   : > { %v648_v33 = vpop.f32.mrf.mxu2  ;;  %v713_v41 = vpop.f32.mrf.mxu3 }
 0x163   : > { %v649_v34 = vadd.f32 %v648_v33, %v1726_v24  ;;  %v714_v42 = vadd.f32 %v713_v41, %v1720_v18  ;;  %v843_v31 = vpop.f32.mrf.mxu1 }
 0x165   : > { %880 = vst [vmem:[%s1779_s27 + $0xb0] sm:$0xff] %v649_v34  ;;  %v779_v17 = vadd.f32 %v778_v62, %v714_v42 }
 0x167   : > { %v844_v61 = vadd.f32 %v843_v31, %v779_v17  ;;  %v781_v8 = vpop.f32.mrf.mxu0 }
 0x169   : > { %881 = vst [vmem:[%s1779_s27 + $0xb8] sm:$0xff] %v844_v61 }
 0x16a   : > { %v651_v30 = vpop.f32.mrf.mxu2  ;;  %v716_v45 = vpop.f32.mrf.mxu3 }
 0x16b   : > { %v652_v43 = vadd.f32 %v651_v30, %v1737_v37  ;;  %v717_v51 = vadd.f32 %v716_v45, %v1731_v25  ;;  %v846_v39 = vpop.f32.mrf.mxu1 }
 0x16d   : > { %882 = vst [vmem:[%s1779_s27 + $0xc0] sm:$0xff] %v652_v43  ;;  %v782_v24 = vadd.f32 %v781_v8, %v717_v51 }
 0x16f   : > { %v847_v4 = vadd.f32 %v846_v39, %v782_v24  ;;  %v784_v18 = vpop.f32.mrf.mxu0 }
 0x171   : > { %883 = vst [vmem:[%s1779_s27 + $0xc8] sm:$0xff] %v847_v4 }
 0x172   : > { %v654_v53 = vpop.f32.mrf.mxu2  ;;  %v719_v56 = vpop.f32.mrf.mxu3 }
 0x173   : > { %v655_v2 = vadd.f32 %v654_v53, %v1748_v54  ;;  %v720_v20 = vadd.f32 %v719_v56, %v1742_v40  ;;  %v849_v52 = vpop.f32.mrf.mxu1 }
 0x175   : > { %884 = vst [vmem:[%s1779_s27 + $0xd0] sm:$0xff] %v655_v2  ;;  %v785_v37 = vadd.f32 %v784_v18, %v720_v20 }
 0x177   : > { %v850_v25 = vadd.f32 %v849_v52, %v785_v37  ;;  %v787_v35 = vpop.f32.mrf.mxu0 }
 0x179   : > { %885 = vst [vmem:[%s1779_s27 + $0xd8] sm:$0xff] %v850_v25 }
 0x17a   : > { %v657_v38 = vpop.f32.mrf.mxu2  ;;  %v722_v47 = vpop.f32.mrf.mxu3 }
 0x17b   : > { %v658_v55 = vadd.f32 %v657_v38, %v1759_v58  ;;  %v723_v11 = vadd.f32 %v722_v47, %v1753_v3  ;;  %v852_v9 = vpop.f32.mrf.mxu1 }
 0x17d   : > { %886 = vst [vmem:[%s1779_s27 + $0xe0] sm:$0xff] %v658_v55  ;;  %v788_v54 = vadd.f32 %v787_v35, %v723_v11 }
 0x17f   : > { %v853_v40 = vadd.f32 %v852_v9, %v788_v54  ;;  %v790_v27 = vpop.f32.mrf.mxu0 }
 0x181   : > { %887 = vst [vmem:[%s1779_s27 + $0xe8] sm:$0xff] %v853_v40 }
 0x182   : > { %v660_v46 = vpop.f32.mrf.mxu2  ;;  %v725_v13 = vpop.f32.mrf.mxu3 }
 0x183   : > { %v661_v58 = vadd.f32 %v660_v46, %v1772_v12  ;;  %v726_v3 = vadd.f32 %v725_v13, %v1764_v1  ;;  %v855_v48 = vpop.f32.mrf.mxu1 }
 0x185   : > { %888 = vst [vmem:[%s1779_s27 + $0xf0] sm:$0xff] %v661_v58  ;;  %v791_v10 = vadd.f32 %v790_v27, %v726_v3 }
 0x187   : > { %v856_v16 = vadd.f32 %v855_v48, %v791_v10 }
 0x189   : > { %889 = vst [vmem:[%s1779_s27 + $0xf8] sm:$0xff] %v856_v16 }
 0x18a   : > { %1225 = shalt.err (!%p1222_p0)
}
 0x18b   : > { %s1292_s6 = smov 256   ;;  %s1293_s22 = smov 16  }
 0x18c   : > { %1061 = dma.vmem_to_hbm [thread:$0]  (%p1389_p5), %s906_s26, 4096, %s908_s28, %s891_s15, %s1292_s6, %s1292_s6, %s1293_s22  }
 0x18d PF: > { %s922_s19 = sand.u32 1, %s1264_s12   ;;  %p1072_p3 = pnand %p1009_p11, %p1363_p6 }
 0x18e   : > { %s923_s27 = scalar_lea.sflag [#allocation4], %s922_s19 }
 0x18f   : > { %p1073_p7 = pneg %p1072_p3 }
 0x191   : > { %1259 = dma.done.wait (%p1073_p7), %s923_s27, 4096  }
 0x192   : > { %1261 = vsyncadd (%p1073_p7), %s923_s27, 4294963200  ;;  %s20_s17 = sadd.s32 1, %s1284_s17   ;;  %s1904_s12 = smov %s1268_s13 }
 0x193   : > { %p17_p9 = scmp.ge.s32.totalorder %s20_s17, 4   ;;  %s1905_s13 = smov %s1272_s14 }
 0x194   : > { %s1906_s14 = smov %s1398_s11  ;;  %s1907_s15 = smov %s1280_s16 }
 0x195   : > { %s1908_s16 = smov %s1910_s5  ;;  %19 = sbr.rel (!%p17_p9) target bundleno = 7 (0x7), region = 81 }
 0x19a   :  { %929 = vsyncpa [#allocation3], 1 }
 0x19b   :  { %931 = vsyncpa [#allocation3 + $0x1], 1 }
 0x19c   :  { %932 = vsyncpa [#allocation6], 1 }
 0x19d   :  { %933 = vsyncpa [#allocation4], 1 }
 0x19e   :  { %935 = vsyncpa [#allocation4 + $0x1], 1 }

</bundles_post_ra>
